<compile_context>
chip_gen: v7x
topology: tpu7x:2x2x1
jax: 0.10.0
libtpu: 0.0.40
codegen_flags: <defaults>
</compile_context>

<pallas_src>
import jax
import jax.numpy as jnp
from jax import lax
from jax.experimental import pallas as pl
from jax.experimental.pallas import tpu as pltpu

# Constants normally imported from harana `tools` (set deterministically here).
HARMONY_UNIT_SPAN = 4   # note frames summed into one harmony unit
NUM_PC = 12             # number of pitch classes kept after the transpose


def _make_kernel(total_len, lane_tile, batch_tile, ragged_t):
    """Build the kernel for static tile sizes / ragged-tail handling."""

    def kernel(m_ref, x_ref, o_ref):
        # m_ref: (lt, tT)        constant block-sum matrix (resident, DMA'd once)
        # x_ref: (tB, Fk, lt)    lane-dense input tile (only surviving features)
        # o_ref: (tB, Fk, tT)    lane-dense output tile
        m = m_ref[...]
        if ragged_t:
            # Lanes past the array end hold stale VMEM garbage; zero them so the
            # matmul cannot propagate NaN/Inf into valid output columns.
            valid = total_len - pl.program_id(1) * lane_tile
        for bi in range(batch_tile):
            xb = x_ref[bi]                                     # (Fk, lt)
            if ragged_t:
                lane = lax.broadcasted_iota(jnp.int32, xb.shape, 1)
                xb = jnp.where(lane < valid, xb, jnp.zeros_like(xb))
            acc = jnp.dot(xb, m, preferred_element_type=jnp.float32)  # (Fk, tT)
            o_ref[bi] = acc.astype(o_ref.dtype)

    return kernel


def pc_transform(note_embedding, batch_size, feature_size):
    # Equivalent of torch .view(B, F, -1, SPAN), kept flat (lane-dense) as (B, F, T*SPAN).
    x = note_embedding.reshape(batch_size, feature_size, -1)
    B, F, L = x.shape
    assert L % HARMONY_UNIT_SPAN == 0
    T = L // HARMONY_UNIT_SPAN
    itemsize = x.dtype.itemsize

    # Only the features that survive the final [..., :NUM_PC] slice.
    f_keep = 16 if F > 16 else F          # 16 = next multiple of 8 >= NUM_PC

    # Fixed, lane-dense time tile; ragged tail handled by in-kernel masking.
    t_tile = T if T <= 256 else 256
    lane_tile = t_tile * HARMONY_UNIT_SPAN
    grid_t = pl.cdiv(T, t_tile)
    ragged_t = (T % t_tile) != 0

    # Batch tile: target ~512 KiB of input per grid step (amortizes per-step
    # overhead); capped at 16 so the static per-row unroll stays small.
    per_row = f_keep * lane_tile * itemsize
    b_tile = max(1, min(B, 16, pl.cdiv(512 * 1024, per_row)))
    grid_b = pl.cdiv(B, b_tile)
    if grid_b * grid_t < 2 and B >= 2:    # give both TensorCores work (v7x megacore)
        b_tile = pl.cdiv(B, 2)
        grid_b = pl.cdiv(B, b_tile)

    # Constant block-sum matrix: M[i, t] = 1 iff i // SPAN == t (exact in bf16 too).
    m = (jnp.arange(lane_tile)[:, None] // HARMONY_UNIT_SPAN
         == jnp.arange(t_tile)[None, :]).astype(x.dtype)

    # VMEM budget from the actual (double-buffered) blocks, plus headroom.
    m_bytes = lane_tile * t_tile * itemsize
    in_bytes = b_tile * f_keep * lane_tile * itemsize
    out_bytes = b_tile * f_keep * t_tile * itemsize
    vmem_limit = min(max(2 * (m_bytes + in_bytes + out_bytes) + (4 << 20), 8 << 20),
                     32 << 20)

    out_ft = pl.pallas_call(
        _make_kernel(L, lane_tile, b_tile, ragged_t),
        out_shape=jax.ShapeDtypeStruct((B, f_keep, T), x.dtype),
        grid_spec=pltpu.PrefetchScalarGridSpec(
            num_scalar_prefetch=0,
            grid=(grid_b, grid_t),
            in_specs=[
                # Block-sum matrix: same block every step -> DMA'd once, resident.
                pl.BlockSpec((lane_tile, t_tile), lambda b, t: (0, 0)),
                # Lane-dense input tile; only the first f_keep features are read.
                pl.BlockSpec((b_tile, f_keep, lane_tile), lambda b, t: (b, 0, t)),
            ],
            # Lane-dense output tile (harmony units on lanes, 128-multiple or full).
            out_specs=pl.BlockSpec((b_tile, f_keep, t_tile), lambda b, t: (b, 0, t)),
        ),
        compiler_params=pltpu.CompilerParams(
            dimension_semantics=("parallel", "parallel"),
            vmem_limit_bytes=vmem_limit,
        ),
    )(m, x)

    # Tiny wrapper-side finish: pitch-class slice + the transpose(1, 2).
    return out_ft[:, :NUM_PC, :].swapaxes(1, 2)


def _reference(note_embedding, B, F):
    return (note_embedding
            .reshape(B, F, -1, HARMONY_UNIT_SPAN)
            .sum(axis=-1)
            .transpose(0, 2, 1)[..., :NUM_PC])


if __name__ == "__main__":
    key = jax.random.PRNGKey(0)

    # Small primary test (matches the module's implied shapes).
    B, FEAT, T = 2, 16, 8
    note_embedding = jax.random.normal(
        key, (B, FEAT, T * HARMONY_UNIT_SPAN), dtype=jnp.float32)
    out = jax.block_until_ready(pc_transform(note_embedding, B, FEAT))
    ref = _reference(note_embedding, B, FEAT)
    assert out.shape == (B, T, NUM_PC), out.shape
    assert jnp.allclose(out, ref, atol=1e-5), "mismatch vs reference (small case)"

    # Secondary test: wide features (feature slimming) + T not divisible by the
    # fixed tile (ragged-tail masking path).
    B2, FEAT2, T2 = 3, 24, 300
    x2 = jax.random.normal(
        jax.random.PRNGKey(0), (B2, FEAT2, T2 * HARMONY_UNIT_SPAN), dtype=jnp.float32)
    out2 = jax.block_until_ready(pc_transform(x2, B2, FEAT2))
    ref2 = _reference(x2, B2, FEAT2)
    assert out2.shape == (B2, T2, NUM_PC), out2.shape
    assert jnp.allclose(out2, ref2, atol=1e-4), "mismatch vs reference (ragged case)"

    print("KERNEL_OK")
</pallas_src>

<mosaic_0001>
module attributes {stable_mosaic.version = 11 : i64} {
  func.func @kernel(%arg0: i32, %arg1: i32, %arg2: memref<32x8xf32, #tpu.memory_space<vmem>>, %arg3: memref<1x16x32xf32, #tpu.memory_space<vmem>>, %arg4: memref<1x16x8xf32, #tpu.memory_space<vmem>>) attributes {dimension_semantics = [#tpu.dimension_semantics<parallel>, #tpu.dimension_semantics<parallel>], iteration_bounds = array<i64: 2, 1>, scalar_prefetch = 0 : i64, scratch_operands = 0 : i64, tpu.core_type = #tpu.core_type<tc>, window_params = [{pipeline_mode = #tpu.pipeline_mode<synchronous>, transform_indices = @transform_0, window_bounds = array<i64: 32, 8>}, {transform_indices = @transform_1, window_bounds = array<i64: 1, 16, 32>}, {transform_indices = @transform_2, window_bounds = array<i64: 1, 16, 8>}]} {
    %c0 = arith.constant 0 : index
    %c0_0 = arith.constant 0 : index
    %0 = vector.load %arg2[%c0, %c0_0] : memref<32x8xf32, #tpu.memory_space<vmem>>, vector<32x8xf32>
    %c0_1 = arith.constant 0 : index
    %c0_2 = arith.constant 0 : index
    %c0_3 = arith.constant 0 : index
    %1 = vector.load %arg3[%c0_1, %c0_2, %c0_3] : memref<1x16x32xf32, #tpu.memory_space<vmem>>, vector<1x16x32xf32>
    %2 = vector.shape_cast %1 : vector<1x16x32xf32> to vector<16x32xf32>
    %cst = arith.constant dense<0.000000e+00> : vector<16x8xf32>
    %3 = tpu.matmul %2, %0, %cst {dimension_numbers = #tpu.dot_dimension_numbers<[1], [0], [0], [1], [0, 0, 1, 1], [], []>} : vector<16x32xf32>, vector<32x8xf32>, vector<16x8xf32> -> vector<16x8xf32>
    %c0_4 = arith.constant 0 : index
    %c0_5 = arith.constant 0 : index
    %c0_6 = arith.constant 0 : index
    %4 = vector.load %arg4[%c0_4, %c0_5, %c0_6] : memref<1x16x8xf32, #tpu.memory_space<vmem>>, vector<1x16x8xf32>
    %5 = vector.shape_cast %4 : vector<1x16x8xf32> to vector<16x8xf32>
    %6 = vector.shape_cast %3 : vector<16x8xf32> to vector<1x16x8xf32>
    tpu.vector_store %arg4[%c0_4, %c0_5, %c0_6], %6 {strides = array<i32>} : memref<1x16x8xf32, #tpu.memory_space<vmem>>, vector<1x16x8xf32>,
    return
  }
  func.func @transform_0(%arg0: i32, %arg1: i32) -> (i32, i32) {
    %c0_i32 = arith.constant 0 : i32
    %c0_i32_0 = arith.constant 0 : i32
    %c0_i32_1 = arith.constant 0 : i32
    return %c0_i32, %c0_i32_0 : i32, i32
  }
  func.func @transform_1(%arg0: i32, %arg1: i32) -> (i32, i32, i32) {
    %c0_i32 = arith.constant 0 : i32
    %c0_i32_0 = arith.constant 0 : i32
    return %arg0, %c0_i32, %arg1 : i32, i32, i32
  }
  func.func @transform_2(%arg0: i32, %arg1: i32) -> (i32, i32, i32) {
    %c0_i32 = arith.constant 0 : i32
    %c0_i32_0 = arith.constant 0 : i32
    return %arg0, %c0_i32, %arg1 : i32, i32, i32
  }
}

</mosaic_0001>

<bundles_post_ra>
// kernel: tpu_custom_call.1
= control target key start
LH: loop header
LB: loop body
LE: loop exit
PB: predicated region body
PF: predicated region fallthrough
CT: control target
= control target key end

     0   :  { %s452_s9 = smov 0   ;;  %s454_s10 = smov 0   ;;  %s497_s0 = inlined_call_operand.vmem [shape: f32[32,8], index: 0, kind: input, shape index: {}]   ;;  %s498_s1 = inlined_call_operand.vmem [shape: f32[2,16,32], index: 1, kind: input, shape index: {}]   ;;  %s499_s2 = inlined_call_operand.vmem [shape: f32[2,16,8], index: 2, kind: output, shape index: {}]  }
   0x1   :  { %s456_s11 = smov 0  }
   0x2 LB: > { %s24_s12 = sadd.s32 1, %s431_s10  ;;  %p353_p0 = scmp.ge.s32.totalorder %s435_s11, 1  ;;  %s435_s11 = sphi %s456_s11, %s12_s11   ;;  %s431_s10 = sphi %s454_s10, %s501_s10   ;;  %s427_s9 = sphi %s452_s9, %s500_s9  }
   0x3   : > { %p26_p1 = scmp.ge.s32.totalorder %s24_s12, 2  ;;  %p131_p2 = scmp.lt.s32.totalorder %s435_s11, 3 }
   0x5   : > { %s503_s12 = smov (%p26_p1, %s24_s12), 0  ;;  %p132_p3 = pnand %p353_p0, %p131_p2 }
   0x6   : > { %v175_v0 = vld [vmem:[%s497_s0] sm:$0xff] (!%p132_p3)  ;;  %v176_v1 = vld [vmem:[%s497_s0 + $0x8] sm:$0xff] (!%p132_p3)  ;;  %v177_v2 = vld [vmem:[%s497_s0 + $0x10] sm:$0xff] (!%p132_p3)  ;;  %p159_p4 = scmp.lt.s32.totalorder (!%p132_p3), %s427_s9, 1  ;;  %vm181_vm0 = vcmask (!%p132_p3), 261120   ;;  %vm263_vm1 = vcmask (!%p132_p3), 64512  }
   0x7   : > { %135 = sbr.rel (%p132_p3) target bundleno = 233 (0xe9), region = 28  ;;  %v381_v3 = vpack.c.bf16 (!%p132_p3), %v176_v1, %v175_v0  ;;  %v178_v4 = vld [vmem:[%s497_s0 + $0x18] sm:$0xff] (!%p132_p3) }
   0x8   : > { %v385_v5 = vpack.c.bf16 (!%p132_p3), %v178_v4, %v177_v2 }
   0x9   : > { %382 = vmatprep.subr.bf16.mxu0 (!%p132_p3), %v381_v3 }
   0xa   : > { %384 = vmatpush3.bf16.msra.mxu0 (!%p132_p3), %v381_v3 }
   0xb   : > { %386 = vmatprep.subr.bf16.mxu0 (!%p132_p3), %v385_v5 }
   0xe   : > { %s505_s9 = smov (!%p159_p4, %s427_s9), 1  ;;  %388 = vmatpush3.bf16.msra.mxu0 %v385_v5 }
   0xf   : > { %s362_s21 = sshll.u32 %s505_s9, 4 }
  0x10   : > { %s166_s24 = scalar_lea.vmem %s498_s1, %s362_s21  ;;  %s174_s27 = scalar_lea.vmem %s499_s2, %s362_s21 }
  0x11   : > { %v179_v6 = vld [vmem:[%s166_s24] sm:$0xff]  ;;  %v180_v7 = vld [vmem:[%s166_s24 + $0x8] sm:$0xff] }
  0x12   : > { %378 = vmatprep.mubr.msk.f32.mxu0 %vm181_vm0, %v179_v6 }
  0x13   : > { %379 = vmatmul.mubr.msk.f32.vlgmr.msra.gmra.mrb[0].mxu0 %vm181_vm0, %v180_v7 }
  0xe6   : > { %v380_v8 = vpop.f32.mrb[0].mxu0 }
  0xe7   : > { %265 = vst.msk [vmem:[%s174_s27 + $0x8] sm:$0xff] %vm263_vm1, %v380_v8  ;;  %v254_v9 = vpop.f32.mrb[1].mxu0 }
  0xe8   : > { %264 = vst.msk [vmem:[%s174_s27] sm:$0xff] %vm263_vm1, %v254_v9 }
  0xe9 PF: > { %s12_s11 = sadd.s32 1, %s435_s11   ;;  %s500_s9 = smov %s431_s10 }
  0xea   : > { %p9_p5 = scmp.ge.s32.totalorder %s12_s11, 4   ;;  %s501_s10 = smov %s503_s12 }
  0xec   :  { %11 = sbr.rel (!%p9_p5) target bundleno = 2 (0x2), region = 58 }

</bundles_post_ra>
